<compile_context>
chip_gen: v7x
topology: tpu7x:2x2x1
jax: 0.10.0
libtpu: 0.0.40
codegen_flags: <defaults>
</compile_context>

<pallas_src>
import math

import jax
import jax.numpy as jnp
from jax.experimental import pallas as pl
from jax.experimental.pallas import tpu as pltpu


def _bernstein_rows(t, p_ref, n_ctrl, binoms):
    """Return [x_row, y_row, z_row], each a lane-dense (1, Kp) f32 vector."""
    u = 1.0 - t
    # Power chains by repeated multiplication (exact at t=0/1, matching torch
    # `t ** idxs` semantics where 0**0 == 1).
    t_pows = [jnp.ones_like(t)]
    u_pows = [jnp.ones_like(u)]
    for _ in range(1, n_ctrl):
        t_pows.append(t_pows[-1] * t)
        u_pows.append(u_pows[-1] * u)
    coefs = [binoms[k] * t_pows[k] * u_pows[n_ctrl - 1 - k] for k in range(n_ctrl)]
    rows = []
    for j in range(3):
        # Control points are SMEM scalars -> splat * vector, minimal vregs.
        acc = coefs[0] * p_ref[0, j]
        for k in range(1, n_ctrl):
            acc = acc + coefs[k] * p_ref[k, j]
        rows.append(acc)                                   # each (1, Kp)
    return rows


def _make_points_kernel(n_ctrl, binoms):
    """Outputs B(t) as a lane-dense (3, Kp) slab (single unmasked store)."""
    def kernel(t_ref, p_ref, o_ref):
        rows = _bernstein_rows(t_ref[...], p_ref, n_ctrl, binoms)
        o_ref[...] = jnp.concatenate(rows, axis=0)         # (3, Kp)
    return kernel


def _make_dists_kernel(n_ctrl, binoms):
    """Fused pass: d[0] = 0, d[i] = ||B(t_i) - B(t_{i-1})||, output (1, Kp)."""
    def kernel(t_ref, p_ref, d_ref):
        rows = _bernstein_rows(t_ref[...], p_ref, n_ctrl, binoms)
        d2 = jnp.zeros_like(rows[0])
        for r in rows:                                     # XLU lane shift, VPU FMA
            dr = r - pltpu.roll(r, shift=1, axis=1)
            d2 = d2 + dr * dr
        lane = jax.lax.broadcasted_iota(jnp.int32, d2.shape, 1)
        d_ref[...] = jnp.where(lane == 0, 0.0, jnp.sqrt(d2))
    return kernel


def _call(kernel_factory, t, P, out_rows):
    """Gridless pallas_call with lane-dense padding to a multiple of 128."""
    K = int(t.shape[0])
    N = int(P.shape[0])
    binoms = tuple(float(math.comb(N - 1, k)) for k in range(N))
    Kp = max(128, ((K + 127) // 128) * 128)
    t2d = jnp.pad(t.astype(jnp.float32).reshape(1, K), ((0, 0), (0, Kp - K)))
    out = pl.pallas_call(
        kernel_factory(N, binoms),
        out_shape=jax.ShapeDtypeStruct((out_rows, Kp), jnp.float32),
        in_specs=[
            pl.BlockSpec(memory_space=pltpu.MemorySpace.VMEM),   # t, lane-dense
            pl.BlockSpec(memory_space=pltpu.MemorySpace.SMEM),   # P, scalar reads
        ],
        out_specs=pl.BlockSpec(memory_space=pltpu.MemorySpace.VMEM),
    )(t2d, P.astype(jnp.float32))
    return out[:, :K]


def bezier_points(t, P):
    """Evaluate the Bezier curve at parameters t (K,) -> (K, 3)."""
    return _call(_make_points_kernel, t, P, out_rows=3).T


def bezier_segment_lengths(t, P):
    """Segment lengths between consecutive B(t_i): (K,), first entry 0."""
    return _call(_make_dists_kernel, t, P, out_rows=1)[0]


def bezier_curve_forward(P, thickness, overlap=0.95, arc_samples=200):
    """JAX/Pallas port of BezierCurve.forward()."""
    t_dense = jnp.linspace(0.0, 1.0, arc_samples, dtype=jnp.float32)

    # Arc-length table: segment lengths are fused into the dense-evaluation
    # kernel; only the tiny cumsum stays in XLA glue.
    dists = bezier_segment_lengths(t_dense, P)                   # (K,)
    cumlen = jnp.cumsum(dists)                                   # cumlen[0] == 0

    # Matches torch `.item()`: total length pulled to host so the output size M
    # is a host-side Python int (dynamic output shapes can't live in a kernel).
    # TODO(synk): a static upper bound on total_len + masking would remove this
    # host round-trip and the M-dependent recompiles of the second call.
    total_len = float(jax.device_get(cumlen[-1]))
    diameter = 2.0 * thickness
    separation = diameter * (1.0 - overlap)
    M = max(1, int(math.ceil(total_len / separation)))

    s_des = jnp.linspace(0.0, total_len, M, dtype=jnp.float32)
    # torch.bucketize(right=False) == searchsorted(side='left')
    idx = jnp.clip(jnp.searchsorted(cumlen, s_des, side="left"), 1, arc_samples - 1)
    c0, c1 = cumlen[idx - 1], cumlen[idx]
    t0, t1 = t_dense[idx - 1], t_dense[idx]
    denom = c1 - c0
    safe = denom > 0.0                       # guard degenerate coincident samples
    w = jnp.where(safe, (s_des - c0) / jnp.where(safe, denom, 1.0), 0.0)
    t_samp = t0 + (t1 - t0) * w              # torch.lerp

    means = bezier_points(t_samp, P)                             # (M, 3)
    thicknesses = jnp.full((M,), thickness, dtype=means.dtype)   # (M,)
    return means, thicknesses


if __name__ == "__main__":
    key = jax.random.PRNGKey(0)
    N_CTRL = 4          # cubic Bezier -> P is (4, 3), as in the module __init__
    ARC_SAMPLES = 64
    THICKNESS = 0.1
    OVERLAP = 0.9

    init_control_points = jax.random.normal(key, (N_CTRL, 3), dtype=jnp.float32)

    # Sanity check the Pallas evaluation against a pure-JAX Bernstein reference.
    t_chk = jnp.linspace(0.0, 1.0, ARC_SAMPLES, dtype=jnp.float32)
    binoms = jnp.array([math.comb(N_CTRL - 1, k) for k in range(N_CTRL)], jnp.float32)
    idxs = jnp.arange(N_CTRL, dtype=jnp.float32)
    tcol = t_chk[:, None]
    coefs_ref = binoms * (tcol ** idxs) * ((1.0 - tcol) ** (N_CTRL - 1 - idxs))
    ref_pts = coefs_ref @ init_control_points
    pal_pts = bezier_points(t_chk, init_control_points)
    assert jnp.allclose(pal_pts, ref_pts, rtol=1e-4, atol=1e-5), "mismatch vs reference"

    means, thicknesses = bezier_curve_forward(
        init_control_points, THICKNESS, overlap=OVERLAP, arc_samples=ARC_SAMPLES
    )
    jax.block_until_ready((means, thicknesses))

    assert means.ndim == 2 and means.shape[1] == 3
    assert thicknesses.shape == (means.shape[0],)
    assert bool(jnp.all(jnp.isfinite(means)))
    print("KERNEL_OK")
</pallas_src>

<mosaic_0001>
module attributes {stable_mosaic.version = 11 : i64} {
  func.func @kernel(%arg0: memref<1x128xf32, #tpu.memory_space<vmem>>, %arg1: memref<4x3xf32, #tpu.memory_space<smem>>, %arg2: memref<3x128xf32, #tpu.memory_space<vmem>>) attributes {dimension_semantics = [], scalar_prefetch = 0 : i64, scratch_operands = 0 : i64, tpu.core_type = #tpu.core_type<tc>} {
    %c0 = arith.constant 0 : index
    %c0_0 = arith.constant 0 : index
    %0 = vector.load %arg0[%c0, %c0_0] : memref<1x128xf32, #tpu.memory_space<vmem>>, vector<1x128xf32>
    %cst = arith.constant 1.000000e+00 : f32
    %1 = vector.broadcast %cst : f32 to vector<1x128xf32>
    %2 = arith.subf %1, %0 : vector<1x128xf32>
    %cst_1 = arith.constant 1.000000e+00 : f32
    %3 = vector.broadcast %cst_1 : f32 to vector<1x128xf32>
    %cst_2 = arith.constant 1.000000e+00 : f32
    %4 = vector.broadcast %cst_2 : f32 to vector<1x128xf32>
    %5 = arith.mulf %3, %0 : vector<1x128xf32>
    %6 = arith.mulf %4, %2 : vector<1x128xf32>
    %7 = arith.mulf %5, %0 : vector<1x128xf32>
    %8 = arith.mulf %6, %2 : vector<1x128xf32>
    %9 = arith.mulf %7, %0 : vector<1x128xf32>
    %10 = arith.mulf %8, %2 : vector<1x128xf32>
    %cst_3 = arith.constant 1.000000e+00 : f32
    %11 = vector.broadcast %cst_3 : f32 to vector<1x128xf32>
    %12 = arith.mulf %11, %3 : vector<1x128xf32>
    %13 = arith.mulf %12, %10 : vector<1x128xf32>
    %cst_4 = arith.constant 3.000000e+00 : f32
    %14 = vector.broadcast %cst_4 : f32 to vector<1x128xf32>
    %15 = arith.mulf %14, %5 : vector<1x128xf32>
    %16 = arith.mulf %15, %8 : vector<1x128xf32>
    %cst_5 = arith.constant 3.000000e+00 : f32
    %17 = vector.broadcast %cst_5 : f32 to vector<1x128xf32>
    %18 = arith.mulf %17, %7 : vector<1x128xf32>
    %19 = arith.mulf %18, %6 : vector<1x128xf32>
    %cst_6 = arith.constant 1.000000e+00 : f32
    %20 = vector.broadcast %cst_6 : f32 to vector<1x128xf32>
    %21 = arith.mulf %20, %9 : vector<1x128xf32>
    %22 = arith.mulf %21, %4 : vector<1x128xf32>
    %c0_7 = arith.constant 0 : index
    %c0_8 = arith.constant 0 : index
    %23 = memref.load %arg1[%c0_7, %c0_8] : memref<4x3xf32, #tpu.memory_space<smem>>
    %24 = vector.broadcast %23 : f32 to vector<1x128xf32>
    %25 = arith.mulf %13, %24 : vector<1x128xf32>
    %c1 = arith.constant 1 : index
    %c0_9 = arith.constant 0 : index
    %26 = memref.load %arg1[%c1, %c0_9] : memref<4x3xf32, #tpu.memory_space<smem>>
    %27 = vector.broadcast %26 : f32 to vector<1x128xf32>
    %28 = arith.mulf %16, %27 : vector<1x128xf32>
    %29 = arith.addf %25, %28 : vector<1x128xf32>
    %c2 = arith.constant 2 : index
    %c0_10 = arith.constant 0 : index
    %30 = memref.load %arg1[%c2, %c0_10] : memref<4x3xf32, #tpu.memory_space<smem>>
    %31 = vector.broadcast %30 : f32 to vector<1x128xf32>
    %32 = arith.mulf %19, %31 : vector<1x128xf32>
    %33 = arith.addf %29, %32 : vector<1x128xf32>
    %c3 = arith.constant 3 : index
    %c0_11 = arith.constant 0 : index
    %34 = memref.load %arg1[%c3, %c0_11] : memref<4x3xf32, #tpu.memory_space<smem>>
    %35 = vector.broadcast %34 : f32 to vector<1x128xf32>
    %36 = arith.mulf %22, %35 : vector<1x128xf32>
    %37 = arith.addf %33, %36 : vector<1x128xf32>
    %c0_12 = arith.constant 0 : index
    %c1_13 = arith.constant 1 : index
    %38 = memref.load %arg1[%c0_12, %c1_13] : memref<4x3xf32, #tpu.memory_space<smem>>
    %39 = vector.broadcast %38 : f32 to vector<1x128xf32>
    %40 = arith.mulf %13, %39 : vector<1x128xf32>
    %c1_14 = arith.constant 1 : index
    %c1_15 = arith.constant 1 : index
    %41 = memref.load %arg1[%c1_14, %c1_15] : memref<4x3xf32, #tpu.memory_space<smem>>
    %42 = vector.broadcast %41 : f32 to vector<1x128xf32>
    %43 = arith.mulf %16, %42 : vector<1x128xf32>
    %44 = arith.addf %40, %43 : vector<1x128xf32>
    %c2_16 = arith.constant 2 : index
    %c1_17 = arith.constant 1 : index
    %45 = memref.load %arg1[%c2_16, %c1_17] : memref<4x3xf32, #tpu.memory_space<smem>>
    %46 = vector.broadcast %45 : f32 to vector<1x128xf32>
    %47 = arith.mulf %19, %46 : vector<1x128xf32>
    %48 = arith.addf %44, %47 : vector<1x128xf32>
    %c3_18 = arith.constant 3 : index
    %c1_19 = arith.constant 1 : index
    %49 = memref.load %arg1[%c3_18, %c1_19] : memref<4x3xf32, #tpu.memory_space<smem>>
    %50 = vector.broadcast %49 : f32 to vector<1x128xf32>
    %51 = arith.mulf %22, %50 : vector<1x128xf32>
    %52 = arith.addf %48, %51 : vector<1x128xf32>
    %c0_20 = arith.constant 0 : index
    %c2_21 = arith.constant 2 : index
    %53 = memref.load %arg1[%c0_20, %c2_21] : memref<4x3xf32, #tpu.memory_space<smem>>
    %54 = vector.broadcast %53 : f32 to vector<1x128xf32>
    %55 = arith.mulf %13, %54 : vector<1x128xf32>
    %c1_22 = arith.constant 1 : index
    %c2_23 = arith.constant 2 : index
    %56 = memref.load %arg1[%c1_22, %c2_23] : memref<4x3xf32, #tpu.memory_space<smem>>
    %57 = vector.broadcast %56 : f32 to vector<1x128xf32>
    %58 = arith.mulf %16, %57 : vector<1x128xf32>
    %59 = arith.addf %55, %58 : vector<1x128xf32>
    %c2_24 = arith.constant 2 : index
    %c2_25 = arith.constant 2 : index
    %60 = memref.load %arg1[%c2_24, %c2_25] : memref<4x3xf32, #tpu.memory_space<smem>>
    %61 = vector.broadcast %60 : f32 to vector<1x128xf32>
    %62 = arith.mulf %19, %61 : vector<1x128xf32>
    %63 = arith.addf %59, %62 : vector<1x128xf32>
    %c3_26 = arith.constant 3 : index
    %c2_27 = arith.constant 2 : index
    %64 = memref.load %arg1[%c3_26, %c2_27] : memref<4x3xf32, #tpu.memory_space<smem>>
    %65 = vector.broadcast %64 : f32 to vector<1x128xf32>
    %66 = arith.mulf %22, %65 : vector<1x128xf32>
    %67 = arith.addf %63, %66 : vector<1x128xf32>
    %68 = tpu.concatenate %37, %52, %67 in 0 : vector<1x128xf32>, vector<1x128xf32>, vector<1x128xf32> -> vector<3x128xf32>
    %c0_28 = arith.constant 0 : index
    %c0_29 = arith.constant 0 : index
    %69 = vector.load %arg2[%c0_28, %c0_29] : memref<3x128xf32, #tpu.memory_space<vmem>>, vector<3x128xf32>
    tpu.vector_store %arg2[%c0_28, %c0_29], %68 {strides = array<i32>} : memref<3x128xf32, #tpu.memory_space<vmem>>, vector<3x128xf32>,
    return
  }
}

</mosaic_0001>

<bundles_post_ra>
// kernel: tpu_custom_call.1
= control target key start
LH: loop header
LB: loop body
LE: loop exit
PB: predicated region body
PF: predicated region fallthrough
CT: control target
= control target key end

     0   :  { %7 = vsyncpa [#allocation3], 0  ;;  %s257_s0 = inlined_call_operand.hbm [shape: f32[1,128], index: 0, kind: input, shape index: {}]   ;;  %s258_s1 = inlined_call_operand.hbm [shape: f32[4,3], index: 1, kind: input, shape index: {}]   ;;  %s259_s2 = inlined_call_operand.hbm [shape: f32[3,128], index: 2, kind: output, shape index: {}]  }
   0x1   :  { %8 = vsyncpa [#allocation5], 0 }
   0x2   :  { %9 = vsyncpa [#allocation4], 0  ;;  %s197_s9 = smov [#allocation2]   ;;  %s137_s13 = scalar_lea.hbm %s257_s0, 16 }
   0x3   :  { %s16_s10 = sshll.u32 %s197_s9, 4  ;;  %p138_p0 = scmp.ne.s32.totalorder %s257_s0, %s137_s13  ;;  %s17_s10 = int_to_ptr.vmem [resolvable:$true] %s16_s10 }
   0x4   :  { %p141_p1 = scmp.lt.u32.totalorder %s137_s13, %s257_s0 }
   0x6   :  { %p143_p2 = pnand %p141_p1, %p138_p0 }
   0x8   :  { %146 = shalt.err (!%p143_p2)
}
   0x9   :  { %s147_s18 = scalar_lea.vmem %s17_s10, 16  ;;  %s151_s19 = scalar_lea.vmem %s17_s10, 32 }
   0xa   :  { %p148_p3 = scmp.ne.s32.totalorder %s17_s10, %s147_s18  ;;  %p152_p4 = scmp.lt.s32.totalorder %s17_s10, %s17_s10 }
   0xb   :  { %p153_p5 = scmp.lt.s32.totalorder %s151_s19, %s147_s18 }
   0xd   :  { %p154_p6 = por %p153_p5, %p152_p4 }
   0xf   :  { %p155_p7 = pnand %p154_p6, %p148_p3 }
  0x11   :  { %158 = shalt.err (!%p155_p7)
}
  0x12   :  { %19 = dma.hbm_to_vmem [thread:$0]  %s257_s0, 16, %s17_s10, [#allocation3]  }
  0x13   :  { %s159_s24 = scalar_lea.hbm %s258_s1, 64 }
  0x14   :  { %p160_p8 = scmp.ne.s32.totalorder %s258_s1, %s159_s24  ;;  %p163_p9 = scmp.lt.u32.totalorder %s159_s24, %s258_s1 }
  0x16   :  { %p165_p10 = pnand %p163_p9, %p160_p8 }
  0x18   :  { %168 = shalt.err (!%p165_p10)
}
  0x19   :  { %s198_s29 = smov [#allocation6]  }
  0x1a   :  { %27 = dma.hbm_to_smem %s258_s1, 64, %s198_s29, [#allocation5]  }
  0x1b   :  { %191 = dma.done.wait [#allocation3], 16  }
  0x1c   :  { %192 = vsyncadd [#allocation3], 4294967280 }
  0x1d   :  { %193 = dma.done.wait [#allocation5], 64  }
  0x1e   :  { %194 = vsyncadd [#allocation5], 4294967232 }
  0x1f   :  { %34 = sfence }
  0x20   :  { %v35_v0 = vld [vmem:[#allocation2] sm:$0x1]  ;;  %s45_s0 = sld [smem:[#allocation6]]  ;;  %v91_v4 = vlaneseq  ;;  %s126_s7 = sld [smem:[#allocation6 + $0x1]]  ;;  %vm102_vm0 = vcmask 1040384   ;;  %vm104_vm1 = vcmask 1041408  }
  0x21   :  { %s123_s4 = sld [smem:[#allocation6 + $0x80]]  ;;  %v36_v1 = vsub.f32 1.0, %v35_v0  ;;  %v37_v2 = vmul.f32 %v35_v0, %v35_v0  ;;  %v41_v3 = vmul.f32 3.0, %v35_v0  ;;  %s127_s8 = sld [smem:[#allocation6 + $0x81]] }
  0x22   :  { %s124_s5 = sld [smem:[#allocation6 + $0x100]]  ;;  %s128_s9 = sld [smem:[#allocation6 + $0x101]]  ;;  %v92_v9 = vshrl.u32 %v91_v4, 7 }
  0x23   :  { %s125_s6 = sld [smem:[#allocation6 + $0x180]]  ;;  %v38_v5 = vmul.f32 %v36_v1, %v36_v1  ;;  %v43_v6 = vmul.f32 3.0, %v37_v2  ;;  %s129_s1 = sld [smem:[#allocation6 + $0x181]]  ;;  %v39_v10 = vmul.f32 %v37_v2, %v35_v0 }
  0x24   :  { %s130_s10 = sld [smem:[#allocation6 + $0x2]]  ;;  %v93_v39 = vsub.s32 0, %v92_v9  ;;  %s199_s14 = smov [#allocation7]  }
  0x25   :  { %s131_s11 = sld [smem:[#allocation6 + $0x82]]  ;;  %v40_v7 = vmul.f32 %v38_v5, %v36_v1  ;;  %v42_v8 = vmul.f32 %v41_v3, %v38_v5  ;;  %v44_v11 = vmul.f32 %v43_v6, %v36_v1  ;;  %s113_s15 = sshll.u32 %s199_s14, 4  ;;  %s114_s15 = int_to_ptr.vmem [resolvable:$true] %s113_s15 }
  0x26   :  { %s239_s12 = sld [smem:[#allocation6 + $0x102]]  ;;  %v46_v12 = vstv %s45_s0  ;;  %v61_v20 = vstv %s126_s7  ;;  %s169_s16 = scalar_lea.vmem %s114_s15, 64 }
  0x27   :  { %s241_s13 = sld [smem:[#allocation6 + $0x182]]  ;;  %v49_v13 = vstv %s123_s4  ;;  %v47_v14 = vmul.f32 %v46_v12, %v40_v7  ;;  %v64_v21 = vstv %s127_s8  ;;  %v62_v23 = vmul.f32 %v61_v20, %v40_v7  ;;  %p170_p11 = scmp.ne.s32.totalorder %s114_s15, %s169_s16 }
  0x28   :  { %v50_v15 = vmul.f32 %v49_v13, %v42_v8  ;;  %v53_v16 = vstv %s124_s5  ;;  %v65_v24 = vmul.f32 %v64_v21, %v42_v8  ;;  %v68_v25 = vstv %s128_s9  ;;  %p174_p12 = scmp.lt.s32.totalorder %s114_s15, %s114_s15  ;;  %p175_p13 = scmp.lt.s32.totalorder %s169_s16, %s169_s16 }
  0x29   :  { %v57_v17 = vstv %s125_s6  ;;  %v54_v18 = vmul.f32 %v53_v16, %v44_v11  ;;  %v69_v26 = vmul.f32 %v68_v25, %v44_v11  ;;  %v72_v27 = vstv %s129_s1 }
  0x2a   :  { %v58_v19 = vmul.f32 %v57_v17, %v39_v10  ;;  %v51_v22 = vadd.f32 %v50_v15, %v47_v14  ;;  %v76_v28 = vstv %s130_s10  ;;  %v66_v31 = vadd.f32 %v65_v24, %v62_v23  ;;  %p176_p0 = por %p175_p13, %p174_p12 }
  0x2b   :  { %v79_v29 = vstv %s131_s11  ;;  %v73_v32 = vmul.f32 %v72_v27, %v39_v10  ;;  %v77_v33 = vmul.f32 %v76_v28, %v40_v7 }
  0x2c   :  { %v55_v30 = vadd.f32 %v54_v18, %v51_v22  ;;  %v80_v34 = vmul.f32 %v79_v29, %v42_v8  ;;  %v83_v35 = vstv %s239_s12  ;;  %v70_v37 = vadd.f32 %v69_v26, %v66_v31  ;;  %p177_p1 = pnand %p176_p0, %p170_p11 }
  0x2d   :  { %v87_v36 = vstv %s241_s13  ;;  %v84_v38 = vmul.f32 %v83_v35, %v44_v11 }
  0x2e   :  { %v81_v40 = vadd.f32 %v80_v34, %v77_v33  ;;  %v88_v41 = vmul.f32 %v87_v36, %v39_v10  ;;  %v59_v42 = vadd.f32 %v58_v19, %v55_v30  ;;  %v74_v43 = vadd.f32 %v73_v32, %v70_v37 }
  0x30   :  { %v85_v44 = vadd.f32 %v84_v38, %v81_v40  ;;  %v94_v45 = vrot.slane %v74_v43, %v93_v39 }
  0x32   :  { %v89_v46 = vadd.f32 %v88_v41, %v85_v44  ;;  %v103_v47 = vsel %vm102_vm0, %v59_v42, %v94_v45 }
  0x34   :  { %v100_v48 = vrot.slane %v89_v46, %v93_v39 }
  0x36   :  { %v105_v49 = vsel %vm104_vm1, %v103_v47, %v100_v48 }
  0x37   :  { %106 = vst [vmem:[#allocation7] sm:$0x7] %v105_v49 }
  0x38   :  { %180 = shalt.err (!%p177_p1)
}
  0x39   :  { %s181_s19 = scalar_lea.hbm %s259_s2, 64 }
  0x3a   :  { %p182_p2 = scmp.ne.s32.totalorder %s259_s2, %s181_s19  ;;  %p185_p3 = scmp.lt.u32.totalorder %s181_s19, %s259_s2 }
  0x3c   :  { %p187_p4 = pnand %p185_p3, %p182_p2 }
  0x3e   :  { %190 = shalt.err (!%p187_p4)
}
  0x3f   :  { %116 = dma.vmem_to_hbm [thread:$0]  %s114_s15, 64, %s259_s2, [#allocation4]  }
  0x40   :  { %195 = dma.done.wait [#allocation4], 64  }
  0x41   :  { %196 = vsyncadd [#allocation4], 4294967232 }
  0x42   :  { %120 = vsyncpa [#allocation3], 1 }
  0x43   :  { %121 = vsyncpa [#allocation4], 1 }
  0x44   :  { %122 = vsyncpa [#allocation5], 1 }

</bundles_post_ra>
